<compile_context>
chip_gen: v5e
topology: v5e:2x2
jax: 0.10.0
libtpu: 0.0.40
codegen_flags: <defaults>
</compile_context>

<pallas_src>
import functools

import jax
import jax.numpy as jnp
import numpy as np
from jax.experimental import pallas as pl
from jax.experimental.pallas import tpu as pltpu


# ------------------------------ helpers ------------------------------------ #

def _round_up(x, m):
    return (x + m - 1) // m * m


def _cdiv(a, b):
    return -(-a // b)


def _vmem_capacity_bytes():
    try:
        return int(pltpu.get_tpu_info().vmem_capacity_bytes)
    except Exception:
        return None


_VMEM_CAP = _vmem_capacity_bytes()


def _choose_layout(hw, n, in_itemsize):
    """Pick (padded HW, lane tile LT, rows R, sublane block SUB, row blocks)."""
    lane = 128
    hwp = _round_up(hw, lane)
    # v7x has only 64 MiB VMEM per TensorCore -> cap the lane tile lower there.
    lt_max = 1024 if (_VMEM_CAP is not None and _VMEM_CAP <= (64 << 20)) else 2048
    sub_t = 8 if in_itemsize >= 4 else 16       # fill f32 / packed-16bit sublanes

    cand = [k * lane for k in range(lt_max // lane, 0, -1)
            if hwp % (k * lane) == 0]

    def layout(lt):
        r = hwp // lt
        sub = min(sub_t, r)
        return r, sub, _cdiv(r, sub)

    # Prefer lane tiles that fill the sublanes; among those, take the largest
    # one that still gives the megacore (v7x: 2 TCs) at least 2 grid blocks.
    pool = [lt for lt in cand if hwp // lt >= sub_t] or cand
    lt = pool[0]
    for c2 in pool:
        if n * layout(c2)[2] >= 2:
            lt = c2
            break
    r, sub, nblk = layout(lt)
    return hwp, lt, r, sub, nblk


def _vmem_limit_bytes(c, sub, lt, in_itemsize):
    tile = sub * lt
    io = 2 * (3 * c * tile * in_itemsize      # double-buffered logit blocks
              + tile * 4                      # target block
              + 3 * tile * 4                  # CE output blocks
              + 3 * sub * 128 * 4)            # SSE partial block
    tmp = 16 * c * tile * 4                   # generous f32 temporaries
    limit = io + tmp + (8 << 20)
    cap = _VMEM_CAP if _VMEM_CAP else (128 << 20)
    return int(max(16 << 20, min(limit, int(cap * 0.75))))


# ------------------------------ Pallas kernel ------------------------------ #

def _heads_kernel(t_ref, p1_ref, p2_ref, p3_ref,
                  o1_ref, o2_ref, o3_ref, *maybe_sse,
                  with_pseudo, inv_t, inv_t_int, n_rows):
    """Fused per-block kernel.

    t_ref   : (SUB, LT) int32 targets
    p*_ref  : (C, SUB, LT) logits (native dtype; upcast to f32 in-kernel)
    o*_ref  : (SUB, LT) f32 per-pixel CE (0 where target == -1 / out of bounds)
    maybe_sse (only with_pseudo): (3, SUB, 128) f32 per-block SSE partials.
    """
    sub, lt = t_ref.shape
    c = p1_ref.shape[0]
    tgt = t_ref[...]                                        # (SUB, LT) int32

    # Ragged-tail handling: inputs are NOT padded in HBM; rows >= n_rows of the
    # (R, LT) pixel grid are out-of-bounds garbage and are masked via selects
    # (never via multiplies, so Inf/NaN garbage cannot propagate).
    j = pl.program_id(1)
    row = jax.lax.broadcasted_iota(jnp.int32, (sub, lt), 0)
    inb = (j * sub + row) < n_rows                          # (SUB, LT) bool
    valid = (tgt != -1) & inb

    # Per-class selection masks, shared by the three heads.
    cls_eq = [tgt == cc for cc in range(c)]

    def head(p_ref, o_ref):
        x = p_ref[...].astype(jnp.float32)                  # (C, SUB, LT)
        m = jnp.max(x, axis=0)                              # C-1 VALU maxes
        e = jnp.exp(x - m[None])                            # EUP; shared w/ softmax
        se = jnp.sum(e, axis=0)                             # C-1 VALU adds
        lse = jnp.log(se) + m
        picked = jnp.where(cls_eq[0], x[0], 0.0)            # C-way select chain
        for cc in range(1, c):
            picked = jnp.where(cls_eq[cc], x[cc], picked)
        o_ref[...] = jnp.where(valid, lse - picked, 0.0)
        if with_pseudo:
            r = pl.reciprocal(se, approx=True)
            r = r * (2.0 - se * r)                          # one Newton step
            return e * r[None]                              # softmax (C,SUB,LT)
        return None

    s1 = head(p1_ref, o1_ref)
    s2 = head(p2_ref, o2_ref)
    s3 = head(p3_ref, o3_ref)

    if with_pseudo:
        (sse_ref,) = maybe_sse
        avg = (s1 + s2 + s3) * (1.0 / 3.0)
        if inv_t_int is not None:                           # T=0.5 -> avg*avg
            sharp = avg
            for _ in range(inv_t_int - 1):
                sharp = sharp * avg
        else:
            sharp = jnp.exp(jnp.log(avg) * inv_t)
        ssum = jnp.sum(sharp, axis=0)
        rs = pl.reciprocal(ssum, approx=True)
        rs = rs * (2.0 - ssum * rs)
        pseudo = sharp * rs[None]

        def sse_partial(s):
            d = s - pseudo
            d2 = jnp.where(inb, jnp.sum(d * d, axis=0), 0.0)   # (SUB, LT)
            # Fold lanes in groups of 128: lane-aligned static slices -> pure
            # VALU vreg adds; the final 128->1 reduce is done on the host.
            acc = d2[:, 0:128]
            for g in range(1, lt // 128):
                acc = acc + d2[:, g * 128:(g + 1) * 128]
            return acc                                          # (SUB, 128)

        sse_ref[0] = sse_partial(s1)
        sse_ref[1] = sse_partial(s2)
        sse_ref[2] = sse_partial(s3)


def _build_heads_call(n, c, r, lt, sub, nblk, in_itemsize, *,
                      with_pseudo, inv_t, inv_t_int):
    grid = (n, nblk)

    logit_spec = pl.BlockSpec((None, c, sub, lt), lambda i, j: (i, 0, j, 0))
    tgt_spec = pl.BlockSpec((None, sub, lt), lambda i, j: (i, j, 0))
    ce_spec = pl.BlockSpec((None, sub, lt), lambda i, j: (i, j, 0))

    out_shape = [jax.ShapeDtypeStruct((n, r, lt), jnp.float32)] * 3
    out_specs = [ce_spec] * 3
    if with_pseudo:
        out_shape.append(
            jax.ShapeDtypeStruct((n, 3 * nblk, sub, 128), jnp.float32))
        out_specs.append(
            pl.BlockSpec((None, 3, sub, 128), lambda i, j: (i, j, 0, 0)))

    kernel = functools.partial(
        _heads_kernel, with_pseudo=with_pseudo, inv_t=inv_t,
        inv_t_int=inv_t_int, n_rows=r)

    return pl.pallas_call(
        kernel,
        grid=grid,
        in_specs=[tgt_spec, logit_spec, logit_spec, logit_spec],
        out_specs=tuple(out_specs),
        out_shape=tuple(out_shape),
        compiler_params=pltpu.CompilerParams(
            dimension_semantics=("parallel", "parallel"),
            vmem_limit_bytes=_vmem_limit_bytes(c, sub, lt, in_itemsize)),
    )


# --------------------- exact k-th statistic selection ----------------------- #

def _fg_selected_mean(losses, mus, fg_mask, num_rem):
    """Mean of `losses` over the `num_rem` smallest-`mus` foreground pixels.

    Exact k-th order statistic via 31 passes of bit-pattern bisection (mus are
    clamped >= 0 so the IEEE bit order matches the numeric order). Batched over
    the 3 heads; replaces three full O(P log P) device sorts.
    """
    mus = jnp.maximum(mus, 0.0)                      # guard fp-negative CE noise
    bits = jax.lax.bitcast_convert_type(mus, jnp.int32)       # (3, P)
    fg = fg_mask[None, :]
    k = num_rem

    def cnt_le(thr):                                           # thr: (3, 1)
        return jnp.sum((fg & (bits <= thr)).astype(jnp.int32), axis=1)

    lo0 = jnp.full((3, 1), -1, jnp.int32)
    hi0 = jnp.full((3, 1), 0x7F800000, jnp.int32)              # +inf bits

    def body(_, lohi):
        lo, hi = lohi
        mid = lo + (hi - lo) // 2                              # no int32 overflow
        ge = (cnt_le(mid) >= k)[:, None]
        return jnp.where(ge, lo, mid), jnp.where(ge, mid, hi)

    _, kth = jax.lax.fori_loop(0, 31, body, (lo0, hi0))        # bits of k-th mu

    sel_lt = fg & (bits < kth)
    sel_eq = fg & (bits == kth)
    cnt_lt = jnp.sum(sel_lt.astype(jnp.int32), axis=1)
    cnt_eq = jnp.maximum(jnp.sum(sel_eq.astype(jnp.int32), axis=1), 1)
    sum_lt = jnp.sum(jnp.where(sel_lt, losses, 0.0), axis=1)
    sum_eq = jnp.sum(jnp.where(sel_eq, losses, 0.0), axis=1)
    # TODO(synk): ties at the k-th mu value with unequal losses are averaged
    # proportionally instead of taken in original index order like argsort.
    take_eq = (k - cnt_lt).astype(jnp.float32)
    kf = jnp.maximum(k, 1).astype(jnp.float32)
    mean = (sum_lt + take_eq * sum_eq / cnt_eq.astype(jnp.float32)) / kf
    return jnp.where(k > 0, mean, 0.0)                         # (3,)


# -------------------------------- CRL loss ---------------------------------- #

class CRLLoss:
    """JAX/Pallas port of the PyTorch CRLLoss module (forward only)."""

    def __init__(self, ss_epoch, ratio=0.5, temperature=0.5, w=0.5):
        self.ss_epoch = ss_epoch
        self.ratio = ratio
        self.T = temperature
        self.w = w
        inv_t = 1.0 / temperature
        r = round(inv_t)
        self._inv_t = inv_t
        self._inv_t_int = int(r) if (abs(inv_t - r) < 1e-6 and 1 <= r <= 8) else None
        self._fwd = jax.jit(self._forward, static_argnames=("use_pseudo",))

    def __call__(self, preds1, preds2, preds3, target, epoch):
        use_pseudo = bool(epoch >= self.ss_epoch)
        weight = epoch / 120 * (1 - self.w) + self.w
        return self._fwd(preds1, preds2, preds3, target, weight,
                         use_pseudo=use_pseudo)

    def _forward(self, preds1, preds2, preds3, target, weight, *, use_pseudo):
        n, c, h, wdt = preds1.shape
        hw = h * wdt
        itemsize = jnp.dtype(preds1.dtype).itemsize
        hwp, lt, r, sub, nblk = _choose_layout(hw, n, itemsize)
        pad = hwp - hw

        def prep(p):
            # NCHW -> (N, C, R, LT): free row-major reshape, no HBM transpose
            # and (when HW % 128 == 0, the common case) no pad/copy either.
            p = p.reshape(n, c, hw)
            if pad:
                # TODO(synk): rare case (HW not a multiple of 128) still pays a
                # full pad-copy of the logits; everything else is copy-free.
                p = jnp.pad(p, ((0, 0), (0, 0), (0, pad)))
            return p.reshape(n, c, r, lt)

        p1, p2, p3 = prep(preds1), prep(preds2), prep(preds3)
        t3 = target.reshape(n, hw).astype(jnp.int32)
        if pad:
            t3 = jnp.pad(t3, ((0, 0), (0, pad)), constant_values=-1)
        t3 = t3.reshape(n, r, lt)

        call = _build_heads_call(
            n, c, r, lt, sub, nblk, itemsize, with_pseudo=use_pseudo,
            inv_t=self._inv_t, inv_t_int=self._inv_t_int)
        outs = call(t3, p1, p2, p3)
        if use_pseudo:
            ce1, ce2, ce3, ssep = outs
        else:
            ce1, ce2, ce3 = outs
            ssep = None

        def flat(lm):
            return lm.reshape(n, hwp)[:, :hw].reshape(-1)

        l1, l2, l3 = flat(ce1), flat(ce2), flat(ce3)
        t = target.reshape(-1)
        mask_bg = (t == 0) | (t == 1)
        mask_fg = (t == 2) | (t == 3)

        fg_cnt = jnp.sum(mask_fg.astype(jnp.int32))
        num_rem = jnp.floor(
            fg_cnt.astype(jnp.float32) * self.ratio).astype(jnp.int32)

        L = jnp.stack([l1, l2, l3])                           # (3, P)
        mu = jnp.stack([l1 + 3.0 * jnp.abs(l2 - l3),
                        l2 + 3.0 * jnp.abs(l3 - l1),
                        l3 + 3.0 * jnp.abs(l1 - l2)])

        fg_mean = _fg_selected_mean(L, mu, mask_fg, num_rem)  # (3,)
        bg_cnt = jnp.maximum(jnp.sum(mask_bg.astype(jnp.int32)),
                             1).astype(jnp.float32)
        bg_mean = jnp.sum(jnp.where(mask_bg[None], L, 0.0), axis=1) / bg_cnt
        upd = 0.5 * (fg_mean + bg_mean)

        if not use_pseudo:
            return upd[0], upd[1], upd[2]

        denom = jnp.float32(n * c * h * wdt)
        # Deferred cross-lane reduce of the per-block (3, SUB, 128) partials.
        sse_tot = ssep.reshape(n, nblk, 3, -1).sum(axis=(0, 1, 3))  # (3,)
        lp = sse_tot / denom
        weight = jnp.float32(weight)
        return (weight * lp[0] + (1.0 - weight) * upd[0],
                weight * lp[1] + (1.0 - weight) * upd[1],
                weight * lp[2] + (1.0 - weight) * upd[2])


# --------------------------- pure-JAX reference ----------------------------- #

def _reference_crl(preds1, preds2, preds3, target, epoch, ss_epoch, ratio, T, w):
    def ce_map(logits, tgt):
        logp = jax.nn.log_softmax(logits, axis=1)                 # (N,C,H,W)
        safe = jnp.where(tgt < 0, 0, tgt)
        oh = jax.nn.one_hot(safe, logits.shape[1], axis=1, dtype=jnp.float32)
        nll = -jnp.sum(logp * oh, axis=1)                         # (N,H,W)
        return jnp.where(tgt == -1, 0.0, nll)

    l1 = ce_map(preds1, target).reshape(-1)
    l2 = ce_map(preds2, target).reshape(-1)
    l3 = ce_map(preds3, target).reshape(-1)
    t = target.reshape(-1)
    mask_bg = (t == 0) | (t == 1)
    mask_fg = (t == 2) | (t == 3)
    f1, f2, f3 = l1[mask_fg], l2[mask_fg], l3[mask_fg]
    mu1 = f1 + 3.0 * jnp.abs(f2 - f3)
    mu2 = f2 + 3.0 * jnp.abs(f3 - f1)
    mu3 = f3 + 3.0 * jnp.abs(f1 - f2)
    nr = int(f1.shape[0] * ratio)
    u1 = (jnp.mean(f1[jnp.argsort(mu1)[:nr]]) + jnp.mean(l1[mask_bg])) / 2
    u2 = (jnp.mean(f2[jnp.argsort(mu2)[:nr]]) + jnp.mean(l2[mask_bg])) / 2
    u3 = (jnp.mean(f3[jnp.argsort(mu3)[:nr]]) + jnp.mean(l3[mask_bg])) / 2
    if epoch < ss_epoch:
        return u1, u2, u3
    weight = epoch / 120 * (1 - w) + w
    s1 = jax.nn.softmax(preds1, axis=1)
    s2 = jax.nn.softmax(preds2, axis=1)
    s3 = jax.nn.softmax(preds3, axis=1)
    avg = (s1 + s2 + s3) / 3.0
    sharp = jnp.power(avg, 1.0 / T)
    pseudo = sharp / jnp.sum(sharp, axis=1, keepdims=True)
    lp1 = jnp.mean((s1 - pseudo) ** 2)
    lp2 = jnp.mean((s2 - pseudo) ** 2)
    lp3 = jnp.mean((s3 - pseudo) ** 2)
    return (weight * lp1 + (1 - weight) * u1,
            weight * lp2 + (1 - weight) * u2,
            weight * lp3 + (1 - weight) * u3)


# ----------------------------------- main ----------------------------------- #

if __name__ == "__main__":
    crl = CRLLoss(ss_epoch=5, ratio=0.5, temperature=0.5, w=0.5)

    # (N, C, H, W): exercises exact-tile, ragged-row-tail (partial blocks) and
    # the rare HW-not-multiple-of-128 padded path.
    configs = [(2, 4, 16, 16), (1, 4, 16, 80), (2, 4, 15, 10)]

    key = jax.random.PRNGKey(0)
    for (N, C, H, W) in configs:
        key, k1, k2, k3, k4 = jax.random.split(key, 5)
        preds1 = jax.random.normal(k1, (N, C, H, W), dtype=jnp.float32)
        preds2 = jax.random.normal(k2, (N, C, H, W), dtype=jnp.float32)
        preds3 = jax.random.normal(k3, (N, C, H, W), dtype=jnp.float32)
        target = jax.random.randint(k4, (N, H, W), -1, 4, dtype=jnp.int32)

        for epoch in (3, 10):  # CE-only branch and fused CE + pseudo branch
            out = crl(preds1, preds2, preds3, target, epoch)
            out = jax.block_until_ready(out)
            ref = _reference_crl(preds1, preds2, preds3, target, epoch,
                                 ss_epoch=5, ratio=0.5, T=0.5, w=0.5)
            for o, r in zip(out, ref):
                np.testing.assert_allclose(np.asarray(o), np.asarray(r),
                                           rtol=5e-4, atol=1e-5)

    print("KERNEL_OK")
</pallas_src>

<mosaic_0001>
module attributes {stable_mosaic.version = 11 : i64} {
  func.func @_heads_kernel(%arg0: i32, %arg1: i32, %arg2: memref<1x1x256xi32, #tpu.memory_space<vmem>>, %arg3: memref<1x4x1x256xf32, #tpu.memory_space<vmem>>, %arg4: memref<1x4x1x256xf32, #tpu.memory_space<vmem>>, %arg5: memref<1x4x1x256xf32, #tpu.memory_space<vmem>>, %arg6: memref<1x1x256xf32, #tpu.memory_space<vmem>>, %arg7: memref<1x1x256xf32, #tpu.memory_space<vmem>>, %arg8: memref<1x1x256xf32, #tpu.memory_space<vmem>>) attributes {dimension_semantics = [#tpu.dimension_semantics<parallel>, #tpu.dimension_semantics<parallel>], iteration_bounds = array<i64: 2, 1>, scalar_prefetch = 0 : i64, scratch_operands = 0 : i64, tpu.core_type = #tpu.core_type<tc>, window_params = [{transform_indices = @transform_0, window_bounds = array<i64: 1, 1, 256>}, {transform_indices = @transform_1, window_bounds = array<i64: 1, 4, 1, 256>}, {transform_indices = @transform_2, window_bounds = array<i64: 1, 4, 1, 256>}, {transform_indices = @transform_3, window_bounds = array<i64: 1, 4, 1, 256>}, {transform_indices = @transform_4, window_bounds = array<i64: 1, 1, 256>}, {transform_indices = @transform_5, window_bounds = array<i64: 1, 1, 256>}, {transform_indices = @transform_6, window_bounds = array<i64: 1, 1, 256>}]} {
    %c0 = arith.constant 0 : index
    %c0_0 = arith.constant 0 : index
    %c0_1 = arith.constant 0 : index
    %0 = vector.load %arg2[%c0, %c0_0, %c0_1] : memref<1x1x256xi32, #tpu.memory_space<vmem>>, vector<1x1x256xi32>
    %1 = vector.shape_cast %0 : vector<1x1x256xi32> to vector<1x256xi32>
    %2 = tpu.iota {dimensions = array<i32: 0>} : vector<1x256xi32>
    %c1_i32 = arith.constant 1 : i32
    %3 = arith.muli %arg1, %c1_i32 : i32
    %4 = vector.broadcast %3 : i32 to vector<1x256xi32>
    %5 = arith.addi %4, %2 : vector<1x256xi32>
    %c1_i32_2 = arith.constant 1 : i32
    %6 = vector.broadcast %c1_i32_2 : i32 to vector<1x256xi32>
    %7 = arith.cmpi slt, %5, %6 : vector<1x256xi32>
    %c-1_i32 = arith.constant -1 : i32
    %8 = vector.broadcast %c-1_i32 : i32 to vector<1x256xi32>
    %9 = arith.cmpi ne, %1, %8 : vector<1x256xi32>
    %10 = arith.andi %9, %7 : vector<1x256xi1>
    %c0_i32 = arith.constant 0 : i32
    %11 = vector.broadcast %c0_i32 : i32 to vector<1x256xi32>
    %12 = arith.cmpi eq, %1, %11 : vector<1x256xi32>
    %c1_i32_3 = arith.constant 1 : i32
    %13 = vector.broadcast %c1_i32_3 : i32 to vector<1x256xi32>
    %14 = arith.cmpi eq, %1, %13 : vector<1x256xi32>
    %c2_i32 = arith.constant 2 : i32
    %15 = vector.broadcast %c2_i32 : i32 to vector<1x256xi32>
    %16 = arith.cmpi eq, %1, %15 : vector<1x256xi32>
    %c3_i32 = arith.constant 3 : i32
    %17 = vector.broadcast %c3_i32 : i32 to vector<1x256xi32>
    %18 = arith.cmpi eq, %1, %17 : vector<1x256xi32>
    %c0_4 = arith.constant 0 : index
    %c0_5 = arith.constant 0 : index
    %c0_6 = arith.constant 0 : index
    %c0_7 = arith.constant 0 : index
    %19 = vector.load %arg3[%c0_4, %c0_5, %c0_6, %c0_7] : memref<1x4x1x256xf32, #tpu.memory_space<vmem>>, vector<1x4x1x256xf32>
    %20 = vector.shape_cast %19 : vector<1x4x1x256xf32> to vector<4x1x256xf32>
    %cst = arith.constant dense<0xFF800000> : vector<1x256xf32>
    %21 = vector.multi_reduction <maximumf>, %20, %cst [0] : vector<4x1x256xf32> to vector<1x256xf32>
    %22 = vector.shape_cast %21 : vector<1x256xf32> to vector<1x1x256xf32>
    %23 = vector.broadcast %22 : vector<1x1x256xf32> to vector<4x1x256xf32>
    %24 = arith.subf %20, %23 : vector<4x1x256xf32>
    %25 = math.exp %24 : vector<4x1x256xf32>
    %cst_8 = arith.constant dense<0.000000e+00> : vector<1x256xf32>
    %26 = vector.multi_reduction <add>, %25, %cst_8 [0] : vector<4x1x256xf32> to vector<1x256xf32>
    %27 = math.log %26 : vector<1x256xf32>
    %28 = arith.addf %27, %21 : vector<1x256xf32>
    %29 = vector.extract_strided_slice %20 {offsets = [0, 0, 0], sizes = [1, 1, 256], strides = [1, 1, 1]} : vector<4x1x256xf32> to vector<1x1x256xf32>
    %30 = vector.shape_cast %29 : vector<1x1x256xf32> to vector<1x256xf32>
    %cst_9 = arith.constant 0.000000e+00 : f32
    %31 = vector.broadcast %cst_9 : f32 to vector<1x256xf32>
    %32 = arith.select %12, %30, %31 : vector<1x256xi1>, vector<1x256xf32>
    %33 = vector.extract_strided_slice %20 {offsets = [1, 0, 0], sizes = [1, 1, 256], strides = [1, 1, 1]} : vector<4x1x256xf32> to vector<1x1x256xf32>
    %34 = vector.shape_cast %33 : vector<1x1x256xf32> to vector<1x256xf32>
    %35 = arith.select %14, %34, %32 : vector<1x256xi1>, vector<1x256xf32>
    %36 = vector.extract_strided_slice %20 {offsets = [2, 0, 0], sizes = [1, 1, 256], strides = [1, 1, 1]} : vector<4x1x256xf32> to vector<1x1x256xf32>
    %37 = vector.shape_cast %36 : vector<1x1x256xf32> to vector<1x256xf32>
    %38 = arith.select %16, %37, %35 : vector<1x256xi1>, vector<1x256xf32>
    %39 = vector.extract_strided_slice %20 {offsets = [3, 0, 0], sizes = [1, 1, 256], strides = [1, 1, 1]} : vector<4x1x256xf32> to vector<1x1x256xf32>
    %40 = vector.shape_cast %39 : vector<1x1x256xf32> to vector<1x256xf32>
    %41 = arith.select %18, %40, %38 : vector<1x256xi1>, vector<1x256xf32>
    %42 = arith.subf %28, %41 : vector<1x256xf32>
    %cst_10 = arith.constant 0.000000e+00 : f32
    %43 = vector.broadcast %cst_10 : f32 to vector<1x256xf32>
    %44 = arith.select %10, %42, %43 : vector<1x256xi1>, vector<1x256xf32>
    %c0_11 = arith.constant 0 : index
    %c0_12 = arith.constant 0 : index
    %c0_13 = arith.constant 0 : index
    %45 = vector.load %arg6[%c0_11, %c0_12, %c0_13] : memref<1x1x256xf32, #tpu.memory_space<vmem>>, vector<1x1x256xf32>
    %46 = vector.shape_cast %45 : vector<1x1x256xf32> to vector<1x256xf32>
    %47 = vector.shape_cast %44 : vector<1x256xf32> to vector<1x1x256xf32>
    tpu.vector_store %arg6[%c0_11, %c0_12, %c0_13], %47 {strides = array<i32>} : memref<1x1x256xf32, #tpu.memory_space<vmem>>, vector<1x1x256xf32>,
    %c0_14 = arith.constant 0 : index
    %c0_15 = arith.constant 0 : index
    %c0_16 = arith.constant 0 : index
    %c0_17 = arith.constant 0 : index
    %48 = vector.load %arg4[%c0_14, %c0_15, %c0_16, %c0_17] : memref<1x4x1x256xf32, #tpu.memory_space<vmem>>, vector<1x4x1x256xf32>
    %49 = vector.shape_cast %48 : vector<1x4x1x256xf32> to vector<4x1x256xf32>
    %cst_18 = arith.constant dense<0xFF800000> : vector<1x256xf32>
    %50 = vector.multi_reduction <maximumf>, %49, %cst_18 [0] : vector<4x1x256xf32> to vector<1x256xf32>
    %51 = vector.shape_cast %50 : vector<1x256xf32> to vector<1x1x256xf32>
    %52 = vector.broadcast %51 : vector<1x1x256xf32> to vector<4x1x256xf32>
    %53 = arith.subf %49, %52 : vector<4x1x256xf32>
    %54 = math.exp %53 : vector<4x1x256xf32>
    %cst_19 = arith.constant dense<0.000000e+00> : vector<1x256xf32>
    %55 = vector.multi_reduction <add>, %54, %cst_19 [0] : vector<4x1x256xf32> to vector<1x256xf32>
    %56 = math.log %55 : vector<1x256xf32>
    %57 = arith.addf %56, %50 : vector<1x256xf32>
    %58 = vector.extract_strided_slice %49 {offsets = [0, 0, 0], sizes = [1, 1, 256], strides = [1, 1, 1]} : vector<4x1x256xf32> to vector<1x1x256xf32>
    %59 = vector.shape_cast %58 : vector<1x1x256xf32> to vector<1x256xf32>
    %cst_20 = arith.constant 0.000000e+00 : f32
    %60 = vector.broadcast %cst_20 : f32 to vector<1x256xf32>
    %61 = arith.select %12, %59, %60 : vector<1x256xi1>, vector<1x256xf32>
    %62 = vector.extract_strided_slice %49 {offsets = [1, 0, 0], sizes = [1, 1, 256], strides = [1, 1, 1]} : vector<4x1x256xf32> to vector<1x1x256xf32>
    %63 = vector.shape_cast %62 : vector<1x1x256xf32> to vector<1x256xf32>
    %64 = arith.select %14, %63, %61 : vector<1x256xi1>, vector<1x256xf32>
    %65 = vector.extract_strided_slice %49 {offsets = [2, 0, 0], sizes = [1, 1, 256], strides = [1, 1, 1]} : vector<4x1x256xf32> to vector<1x1x256xf32>
    %66 = vector.shape_cast %65 : vector<1x1x256xf32> to vector<1x256xf32>
    %67 = arith.select %16, %66, %64 : vector<1x256xi1>, vector<1x256xf32>
    %68 = vector.extract_strided_slice %49 {offsets = [3, 0, 0], sizes = [1, 1, 256], strides = [1, 1, 1]} : vector<4x1x256xf32> to vector<1x1x256xf32>
    %69 = vector.shape_cast %68 : vector<1x1x256xf32> to vector<1x256xf32>
    %70 = arith.select %18, %69, %67 : vector<1x256xi1>, vector<1x256xf32>
    %71 = arith.subf %57, %70 : vector<1x256xf32>
    %cst_21 = arith.constant 0.000000e+00 : f32
    %72 = vector.broadcast %cst_21 : f32 to vector<1x256xf32>
    %73 = arith.select %10, %71, %72 : vector<1x256xi1>, vector<1x256xf32>
    %c0_22 = arith.constant 0 : index
    %c0_23 = arith.constant 0 : index
    %c0_24 = arith.constant 0 : index
    %74 = vector.load %arg7[%c0_22, %c0_23, %c0_24] : memref<1x1x256xf32, #tpu.memory_space<vmem>>, vector<1x1x256xf32>
    %75 = vector.shape_cast %74 : vector<1x1x256xf32> to vector<1x256xf32>
    %76 = vector.shape_cast %73 : vector<1x256xf32> to vector<1x1x256xf32>
    tpu.vector_store %arg7[%c0_22, %c0_23, %c0_24], %76 {strides = array<i32>} : memref<1x1x256xf32, #tpu.memory_space<vmem>>, vector<1x1x256xf32>,
    %c0_25 = arith.constant 0 : index
    %c0_26 = arith.constant 0 : index
    %c0_27 = arith.constant 0 : index
    %c0_28 = arith.constant 0 : index
    %77 = vector.load %arg5[%c0_25, %c0_26, %c0_27, %c0_28] : memref<1x4x1x256xf32, #tpu.memory_space<vmem>>, vector<1x4x1x256xf32>
    %78 = vector.shape_cast %77 : vector<1x4x1x256xf32> to vector<4x1x256xf32>
    %cst_29 = arith.constant dense<0xFF800000> : vector<1x256xf32>
    %79 = vector.multi_reduction <maximumf>, %78, %cst_29 [0] : vector<4x1x256xf32> to vector<1x256xf32>
    %80 = vector.shape_cast %79 : vector<1x256xf32> to vector<1x1x256xf32>
    %81 = vector.broadcast %80 : vector<1x1x256xf32> to vector<4x1x256xf32>
    %82 = arith.subf %78, %81 : vector<4x1x256xf32>
    %83 = math.exp %82 : vector<4x1x256xf32>
    %cst_30 = arith.constant dense<0.000000e+00> : vector<1x256xf32>
    %84 = vector.multi_reduction <add>, %83, %cst_30 [0] : vector<4x1x256xf32> to vector<1x256xf32>
    %85 = math.log %84 : vector<1x256xf32>
    %86 = arith.addf %85, %79 : vector<1x256xf32>
    %87 = vector.extract_strided_slice %78 {offsets = [0, 0, 0], sizes = [1, 1, 256], strides = [1, 1, 1]} : vector<4x1x256xf32> to vector<1x1x256xf32>
    %88 = vector.shape_cast %87 : vector<1x1x256xf32> to vector<1x256xf32>
    %cst_31 = arith.constant 0.000000e+00 : f32
    %89 = vector.broadcast %cst_31 : f32 to vector<1x256xf32>
    %90 = arith.select %12, %88, %89 : vector<1x256xi1>, vector<1x256xf32>
    %91 = vector.extract_strided_slice %78 {offsets = [1, 0, 0], sizes = [1, 1, 256], strides = [1, 1, 1]} : vector<4x1x256xf32> to vector<1x1x256xf32>
    %92 = vector.shape_cast %91 : vector<1x1x256xf32> to vector<1x256xf32>
    %93 = arith.select %14, %92, %90 : vector<1x256xi1>, vector<1x256xf32>
    %94 = vector.extract_strided_slice %78 {offsets = [2, 0, 0], sizes = [1, 1, 256], strides = [1, 1, 1]} : vector<4x1x256xf32> to vector<1x1x256xf32>
    %95 = vector.shape_cast %94 : vector<1x1x256xf32> to vector<1x256xf32>
    %96 = arith.select %16, %95, %93 : vector<1x256xi1>, vector<1x256xf32>
    %97 = vector.extract_strided_slice %78 {offsets = [3, 0, 0], sizes = [1, 1, 256], strides = [1, 1, 1]} : vector<4x1x256xf32> to vector<1x1x256xf32>
    %98 = vector.shape_cast %97 : vector<1x1x256xf32> to vector<1x256xf32>
    %99 = arith.select %18, %98, %96 : vector<1x256xi1>, vector<1x256xf32>
    %100 = arith.subf %86, %99 : vector<1x256xf32>
    %cst_32 = arith.constant 0.000000e+00 : f32
    %101 = vector.broadcast %cst_32 : f32 to vector<1x256xf32>
    %102 = arith.select %10, %100, %101 : vector<1x256xi1>, vector<1x256xf32>
    %c0_33 = arith.constant 0 : index
    %c0_34 = arith.constant 0 : index
    %c0_35 = arith.constant 0 : index
    %103 = vector.load %arg8[%c0_33, %c0_34, %c0_35] : memref<1x1x256xf32, #tpu.memory_space<vmem>>, vector<1x1x256xf32>
    %104 = vector.shape_cast %103 : vector<1x1x256xf32> to vector<1x256xf32>
    %105 = vector.shape_cast %102 : vector<1x256xf32> to vector<1x1x256xf32>
    tpu.vector_store %arg8[%c0_33, %c0_34, %c0_35], %105 {strides = array<i32>} : memref<1x1x256xf32, #tpu.memory_space<vmem>>, vector<1x1x256xf32>,
    return
  }
  func.func @transform_0(%arg0: i32, %arg1: i32) -> (i32, i32, i32) {
    %c0_i32 = arith.constant 0 : i32
    %c0_i32_0 = arith.constant 0 : i32
    return %arg0, %arg1, %c0_i32 : i32, i32, i32
  }
  func.func @transform_1(%arg0: i32, %arg1: i32) -> (i32, i32, i32, i32) {
    %c0_i32 = arith.constant 0 : i32
    %c0_i32_0 = arith.constant 0 : i32
    %c0_i32_1 = arith.constant 0 : i32
    return %arg0, %c0_i32, %arg1, %c0_i32_0 : i32, i32, i32, i32
  }
  func.func @transform_2(%arg0: i32, %arg1: i32) -> (i32, i32, i32, i32) {
    %c0_i32 = arith.constant 0 : i32
    %c0_i32_0 = arith.constant 0 : i32
    %c0_i32_1 = arith.constant 0 : i32
    return %arg0, %c0_i32, %arg1, %c0_i32_0 : i32, i32, i32, i32
  }
  func.func @transform_3(%arg0: i32, %arg1: i32) -> (i32, i32, i32, i32) {
    %c0_i32 = arith.constant 0 : i32
    %c0_i32_0 = arith.constant 0 : i32
    %c0_i32_1 = arith.constant 0 : i32
    return %arg0, %c0_i32, %arg1, %c0_i32_0 : i32, i32, i32, i32
  }
  func.func @transform_4(%arg0: i32, %arg1: i32) -> (i32, i32, i32) {
    %c0_i32 = arith.constant 0 : i32
    %c0_i32_0 = arith.constant 0 : i32
    return %arg0, %arg1, %c0_i32 : i32, i32, i32
  }
  func.func @transform_5(%arg0: i32, %arg1: i32) -> (i32, i32, i32) {
    %c0_i32 = arith.constant 0 : i32
    %c0_i32_0 = arith.constant 0 : i32
    return %arg0, %arg1, %c0_i32 : i32, i32, i32
  }
  func.func @transform_6(%arg0: i32, %arg1: i32) -> (i32, i32, i32) {
    %c0_i32 = arith.constant 0 : i32
    %c0_i32_0 = arith.constant 0 : i32
    return %arg0, %arg1, %c0_i32 : i32, i32, i32
  }
}

</mosaic_0001>

<bundles_post_ra>
// kernel: custom-call.1
= control target key start
LH: loop header
LB: loop body
LE: loop exit
PB: predicated region body
PF: predicated region fallthrough
CT: control target
= control target key end

     0   :  { %s6_s0 = inlined_call_operand.vmem [shape: s32[3,1], index: 0, kind: output, shape index: {}]  }

// kernel: _forward.1
= control target key start
LH: loop header
LB: loop body
LE: loop exit
PB: predicated region body
PF: predicated region fallthrough
CT: control target
= control target key end

     0   :  { %s1061_s21 = smov 0   ;;  %s1063_s22 = smov 0   ;;  %s1309_s0 = inlined_call_operand.vmem [shape: s32[2,1,256], index: 0, kind: input, shape index: {}]   ;;  %s1310_s1 = inlined_call_operand.vmem [shape: f32[2,4,1,256], index: 1, kind: input, shape index: {}]   ;;  %s1311_s2 = inlined_call_operand.vmem [shape: f32[2,4,1,256], index: 2, kind: input, shape index: {}]   ;;  %s1312_s3 = inlined_call_operand.vmem [shape: f32[2,4,1,256], index: 3, kind: input, shape index: {}]   ;;  %s1313_s4 = inlined_call_operand.vmem [shape: f32[2,1,256], index: 4, kind: output, shape index: {0}]   ;;  %s1314_s5 = inlined_call_operand.vmem [shape: f32[2,1,256], index: 5, kind: output, shape index: {1}]   ;;  %s1315_s6 = inlined_call_operand.vmem [shape: f32[2,1,256], index: 6, kind: output, shape index: {2}]  }
   0x1   :  { %s1065_s23 = smov 0  }
   0x2 LB: > { %s29_s24 = sadd.s32 1, %s1019_s22  ;;  %p930_p0 = scmp.ge.s32.totalorder %s1023_s23, 1  ;;  %s1023_s23 = sphi %s1065_s23, %s17_s23   ;;  %s1019_s22 = sphi %s1063_s22, %s1323_s22   ;;  %s1015_s21 = sphi %s1061_s21, %s1322_s21  }
   0x3   : > { %p31_p1 = scmp.ge.s32.totalorder %s29_s24, 2  ;;  %p285_p2 = scmp.lt.s32.totalorder %s1023_s23, 3 }
   0x5   : > { %s1325_s24 = smov (%p31_p1, %s29_s24), 0  ;;  %p286_p3 = pnand %p930_p0, %p285_p2 }
   0x6   : > { %p361_p4 = scmp.lt.s32.totalorder (!%p286_p3), %s1015_s21, 1 }
   0x7   : > { %289 = sbr.rel (%p286_p3) target bundleno = 85 (0x55), region = 36 }
   0xc   : > { %s1327_s21 = smov (!%p361_p4, %s1015_s21), 1  ;;  %v418_v0 = vlaneseq  ;;  %vm479_vm4 = vcmask 1040384  }
   0xd   : > { %s1079_s25 = sshll.u32 %s1327_s21, 1  ;;  %s932_s26 = sshll.u32 %s1327_s21, 3 }
   0xe   : > { %s368_s29 = scalar_lea.vmem %s1309_s0, %s1079_s25  ;;  %s376_s8 = scalar_lea.vmem %s1310_s1, %s932_s26  ;;  %vm1092_vm0 = vcmp.lt.s32.totalorder %v418_v0, 256  ;;  %v1181_v53 = vshrl.u32 %v418_v0, 7 }
   0xf   : > { %s384_s11 = scalar_lea.vmem %s1311_s2, %s932_s26  ;;  %v432_v1 = vld [vmem:[%s376_s8] sm:$0x3]  ;;  %v433_v3 = vld [vmem:[%s376_s8 + $0x2] sm:$0x3]  ;;  %v1098_v5 = vld [vmem:[%s376_s8 + $0x4] sm:$0x3]  ;;  %s392_s14 = scalar_lea.vmem %s1312_s3, %s932_s26 }
  0x10   : > { %v1096_v4 = vld [vmem:[%s368_s29] sm:$0x3]  ;;  %v1100_v6 = vld [vmem:[%s376_s8 + $0x6] sm:$0x3]  ;;  %v440_v7 = vsel %vm1092_vm0, %v432_v1, -inf  ;;  %v441_v8 = vsel %vm1092_vm0, %v433_v3, -inf  ;;  %s400_s17 = scalar_lea.vmem %s1313_s4, %s1079_s25  ;;  %s408_s20 = scalar_lea.vmem %s1314_s5, %s1079_s25 }
  0x11   : > { %v442_v9 = vsel %vm1092_vm0, %v1098_v5, -inf  ;;  %v443_v10 = vsel %vm1092_vm0, %v1100_v6, -inf  ;;  %v1112_v11 = vld [vmem:[%s384_s11] sm:$0x3]  ;;  %v444_v12 = vmax.f32 %v440_v7, %v441_v8  ;;  %v1114_v14 = vld [vmem:[%s384_s11 + $0x2] sm:$0x3]  ;;  %s416_s27 = scalar_lea.vmem %s1315_s6, %s1079_s25 }
  0x12   : > { %v445_v13 = vmax.f32 %v442_v9, %v443_v10  ;;  %v1116_v15 = vld [vmem:[%s384_s11 + $0x4] sm:$0x3]  ;;  %v527_v16 = vsel %vm1092_vm0, %v1112_v11, -inf  ;;  %v1124_v17 = vld [vmem:[%s384_s11 + $0x6] sm:$0x3]  ;;  %v528_v18 = vsel %vm1092_vm0, %v1114_v14, -inf }
  0x13   : > { %v529_v19 = vsel %vm1092_vm0, %v1116_v15, -inf  ;;  %v530_v21 = vsel %vm1092_vm0, %v1124_v17, -inf  ;;  %v531_v22 = vmax.f32 %v527_v16, %v528_v18  ;;  %vm428_vm1 = vcmp.eq.s32.totalorder %v1096_v4, 0  ;;  %v1144_v28 = vld [vmem:[%s392_s14] sm:$0x3] }
  0x14   : > { %v1132_v20 = vmax.f32 %v444_v12, %v445_v13  ;;  %v532_v23 = vmax.f32 %v529_v19, %v530_v21  ;;  %v1146_v29 = vld [vmem:[%s392_s14 + $0x2] sm:$0x3]  ;;  %vm429_vm2 = vcmp.eq.s32.totalorder %v1096_v4, 1  ;;  %v1149_v30 = vld [vmem:[%s392_s14 + $0x4] sm:$0x3]  ;;  %v505_v37 = vsel %vm428_vm1, %v432_v1, 0.0 }
  0x15   : > { %v1151_v31 = vld [vmem:[%s392_s14 + $0x6] sm:$0x3]  ;;  %v613_v38 = vsel %vm1092_vm0, %v1144_v28, -inf  ;;  %v614_v39 = vsel %vm1092_vm0, %v1146_v29, -inf  ;;  %v615_v44 = vsel %vm1092_vm0, %v1149_v30, -inf  ;;  %vm430_vm3 = vcmp.eq.s32.totalorder %v1096_v4, 2 }
  0x16   : > { %v447_v24 = vsub.f32 %v432_v1, %v1132_v20  ;;  %v448_v25 = vsub.f32 %v433_v3, %v1132_v20  ;;  %v449_v26 = vsub.f32 %v1098_v5, %v1132_v20  ;;  %v450_v27 = vsub.f32 %v1100_v6, %v1132_v20 }
  0x17   : > { %v1153_v35 = vmax.f32 %v531_v22, %v532_v23  ;;  %v616_v45 = vsel %vm1092_vm0, %v1151_v31, -inf  ;;  %v617_v50 = vmax.f32 %v613_v38, %v614_v39  ;;  %v506_v51 = vsel %vm429_vm2, %v433_v3, %v505_v37 }
  0x18   : > { %v451_v32 = vmul.f32 1.442695, %v447_v24  ;;  %v453_v33 = vmul.f32 1.442695, %v448_v25  ;;  %v455_v34 = vmul.f32 1.442695, %v449_v26  ;;  %v618_v52 = vmax.f32 %v615_v44, %v616_v45 }
  0x19   : > { %v457_v36 = vmul.f32 1.442695, %v450_v27  ;;  %v534_v40 = vsub.f32 %v1112_v11, %v1153_v35  ;;  %v535_v41 = vsub.f32 %v1114_v14, %v1153_v35  ;;  %v536_v42 = vsub.f32 %v1116_v15, %v1153_v35 }
  0x1a   : > { %965 = vpow2.f32 %v451_v32  ;;  %v537_v43 = vsub.f32 %v1124_v17, %v1153_v35  ;;  %v1183_v55 = vmax.f32 %v617_v50, %v618_v52  ;;  %v1188_v59 = vsel %vm430_vm3, %v1098_v5, %v506_v51 }
  0x1b   : > { %967 = vpow2.f32 %v453_v33  ;;  %v538_v46 = vmul.f32 1.442695, %v534_v40  ;;  %v540_v47 = vmul.f32 1.442695, %v535_v41  ;;  %v542_v48 = vmul.f32 1.442695, %v536_v42 }
  0x1c   : > { %969 = vpow2.f32 %v455_v34  ;;  %v544_v49 = vmul.f32 1.442695, %v537_v43  ;;  %v620_v63 = vsub.f32 %v1144_v28, %v1183_v55  ;;  %v621_v0 = vsub.f32 %v1146_v29, %v1183_v55 }
  0x1d   : > { %971 = vpow2.f32 %v457_v36  ;;  %vm422_vm5 = vcmp.lt.s32.totalorder %v1181_v53, 1  ;;  %vm431_vm6 = vcmp.eq.s32.totalorder %v1096_v4, 3  ;;  %v591_v50 = vsel %vm428_vm1, %v1112_v11, 0.0 }
  0x1e   : > { %973 = vpow2.f32 %v538_v46  ;;  %v626_v11 = vmul.f32 1.442695, %v621_v0  ;;  %vm423_vm7 = vcmp.ne.s32.totalorder %v1096_v4, 4294967295 }
  0x1f   : > { %975 = vpow2.f32 %v540_v47 }
  0x20   : > { %v966_v54 = vpop.eup %965  ;;  %977 = vpow2.f32 %v542_v48 }
  0x21   : > { %v968_v56 = vpop.eup %967  ;;  %v463_v57 = vperm.slane %v966_v54, 0  ;;  %v464_v58 = vperm.slane %v966_v54, 1  ;;  %979 = vpow2.f32 %v544_v49 }
  0x22   : > { %v970_v60 = vpop.eup %969  ;;  %v465_v61 = vperm.slane %v968_v56, 0  ;;  %v466_v62 = vperm.slane %v968_v56, 1 }
  0x23   : > { %v972_v1 = vpop.eup %971  ;;  %v467_v3 = vperm.slane %v970_v60, 0  ;;  %v468_v7 = vperm.slane %v970_v60, 1  ;;  %v480_v8 = vsel %vm479_vm4, %v463_v57, 0.0  ;;  %v487_v5 = vsel %vm479_vm4, %v464_v58, 0.0 }
  0x24   : > { %v974_v9 = vpop.eup %973  ;;  %v469_v10 = vperm.slane %v972_v1, 0  ;;  %v470_v12 = vperm.slane %v972_v1, 1  ;;  %v481_v13 = vsel %vm479_vm4, %v465_v61, 0.0  ;;  %v488_v16 = vsel %vm479_vm4, %v466_v62, 0.0 }
  0x25   : > { %v976_v18 = vpop.eup %975  ;;  %v482_v19 = vadd.f32 %v481_v13, %v480_v8  ;;  %v483_v21 = vsel %vm479_vm4, %v467_v3, 0.0  ;;  %v489_v22 = vadd.f32 %v488_v16, %v487_v5  ;;  %v490_v23 = vsel %vm479_vm4, %v468_v7, 0.0 }
  0x26   : > { %v978_v24 = vpop.eup %977  ;;  %v485_v25 = vsel %vm479_vm4, %v469_v10, 0.0  ;;  %v492_v26 = vsel %vm479_vm4, %v470_v12, 0.0  ;;  %v550_v27 = vperm.slane %v974_v9, 0  ;;  %v551_v32 = vperm.slane %v974_v9, 1 }
  0x27   : > { %v980_v33 = vpop.eup %979  ;;  %v484_v34 = vadd.f32 %v483_v21, %v482_v19  ;;  %v491_v36 = vadd.f32 %v490_v23, %v489_v22  ;;  %v552_v37 = vperm.slane %v976_v18, 0  ;;  %v553_v38 = vperm.slane %v976_v18, 1 }
  0x28   : > { %v554_v39 = vperm.slane %v978_v24, 0  ;;  %v555_v40 = vperm.slane %v978_v24, 1  ;;  %v556_v41 = vperm.slane %v980_v33, 0  ;;  %v557_v42 = vperm.slane %v980_v33, 1 }
  0x29   : > { %v486_v43 = vadd.f32 %v485_v25, %v484_v34  ;;  %v493_v44 = vadd.f32 %v492_v26, %v491_v36  ;;  %v566_v45 = vsel %vm479_vm4, %v550_v27, 0.0  ;;  %v567_v46 = vsel %vm479_vm4, %v552_v37, 0.0 }
  0x2a   : > { %v568_v47 = vadd.f32 %v567_v46, %v566_v45  ;;  %v569_v48 = vsel %vm479_vm4, %v554_v39, 0.0  ;;  %v573_v49 = vsel %vm479_vm4, %v551_v32, 0.0  ;;  %v571_v51 = vsel %vm479_vm4, %v556_v41, 0.0 }
  0x2b   : > { %981 = vlog2.f32 %v486_v43  ;;  %v574_v52 = vsel %vm479_vm4, %v553_v38, 0.0  ;;  %v576_v54 = vsel %vm479_vm4, %v555_v40, 0.0  ;;  %v622_v58 = vsub.f32 %v1149_v30, %v1183_v55 }
  0x2c   : > { %983 = vlog2.f32 %v493_v44  ;;  %v570_v56 = vadd.f32 %v569_v48, %v568_v47  ;;  %v575_v57 = vadd.f32 %v574_v52, %v573_v49  ;;  %v578_v60 = vsel %vm479_vm4, %v557_v42, 0.0 }
  0x2d   : > { %v623_v61 = vsub.f32 %v1151_v31, %v1183_v55  ;;  %v624_v62 = vmul.f32 1.442695, %v620_v63  ;;  %v1025_v1 = vmov 0   ;;  %v508_v5 = vsel %vm431_vm6, %v1100_v6, %v1188_v59 }
  0x2e   : > { %v424_v3 = vsel %vm422_vm5, 1, %v1025_v1  ;;  %v572_v7 = vadd.f32 %v571_v51, %v570_v56  ;;  %v577_v8 = vadd.f32 %v576_v54, %v575_v57  ;;  %v592_v9 = vsel %vm429_vm2, %v1114_v14, %v591_v50 }
  0x2f   : > { %985 = vpow2.f32 %v624_v62  ;;  %v628_v10 = vmul.f32 1.442695, %v622_v58  ;;  %v499_v63 = vperm.slane %v1132_v20, 0  ;;  %v630_v12 = vmul.f32 1.442695, %v623_v61 }
  0x30   : > { %v579_v0 = vadd.f32 %v578_v60, %v577_v8  ;;  %987 = vlog2.f32 %v572_v7  ;;  %v500_v13 = vperm.slane %v1132_v20, 1  ;;  %v425_v18 = vperm.slane %v424_v3, 0 }
  0x31   : > { %v982_v53 = vpop.eup %981  ;;  %989 = vpow2.f32 %v626_v11  ;;  %v593_v6 = vsel %vm430_vm3, %v1116_v15, %v592_v9  ;;  %v510_v59 = vperm.slane %v508_v5, 0  ;;  %v511_v21 = vperm.slane %v508_v5, 1 }
  0x32   : > { %v984_v16 = vpop.eup %983  ;;  %v495_v19 = vmul.f32 0.6931472, %v982_v53  ;;  %991 = vlog2.f32 %v579_v0  ;;  %v585_v20 = vperm.slane %v1153_v35, 0  ;;  %v594_v25 = vsel %vm431_vm6, %v1124_v17, %v593_v6 }
  0x33   : > { %v497_v14 = vmul.f32 0.6931472, %v984_v16  ;;  %993 = vpow2.f32 %v628_v10  ;;  %vm1238_vm8 = vcmp.ne.s32.totalorder %v425_v18, 0  ;;  %v586_v15 = vperm.slane %v1153_v35, 1 }
  0x34   : > { %v503_v22 = vadd.f32 %v499_v63, %v495_v19  ;;  %995 = vpow2.f32 %v630_v12  ;;  %v596_v39 = vperm.slane %v594_v25, 0  ;;  %v597_v41 = vperm.slane %v594_v25, 1  ;;  %vm1248_vm9 = vmand %vm423_vm7, %vm1238_vm8 }
  0x35   : > { %v986_v23 = vpop.eup %985  ;;  %v504_v24 = vadd.f32 %v500_v13, %v497_v14  ;;  %v677_v63 = vsel %vm428_vm1, %v1144_v28, 0.0  ;;  %v671_v6 = vperm.slane %v1183_v55, 0 }
  0x36   : > { %v988_v26 = vpop.eup %987  ;;  %v636_v32 = vperm.slane %v986_v23, 0  ;;  %v637_v33 = vperm.slane %v986_v23, 1  ;;  %v514_v36 = vsub.f32 %v503_v22, %v510_v59  ;;  %v678_v18 = vsel %vm429_vm2, %v1146_v29, %v677_v63 }
  0x37   : > { %v990_v34 = vpop.eup %989  ;;  %v515_v37 = vsub.f32 %v504_v24, %v511_v21  ;;  %v581_v38 = vmul.f32 0.6931472, %v988_v26  ;;  %v679_v28 = vsel %vm430_vm3, %v1149_v30, %v678_v18  ;;  %v672_v59 = vperm.slane %v1183_v55, 1 }
  0x38   : > { %v992_v40 = vpop.eup %991  ;;  %v638_v42 = vperm.slane %v990_v34, 0  ;;  %v639_v43 = vperm.slane %v990_v34, 1  ;;  %v652_v17 = vsel %vm479_vm4, %v636_v32, 0.0  ;;  %v659_v48 = vsel %vm479_vm4, %v637_v33, 0.0 }
  0x39   : > { %v994_v44 = vpop.eup %993  ;;  %v518_v45 = vrot.slane %v515_v37, 7  ;;  %v583_v46 = vmul.f32 0.6931472, %v992_v40  ;;  %v589_v47 = vadd.f32 %v585_v20, %v581_v38  ;;  %v680_v14 = vsel %vm431_vm6, %v1151_v31, %v679_v28 }
  0x3a   : > { %v996_v49 = vpop.eup %995  ;;  %v640_v50 = vperm.slane %v994_v44, 0  ;;  %v641_v51 = vperm.slane %v994_v44, 1  ;;  %v653_v52 = vsel %vm479_vm4, %v638_v42, 0.0  ;;  %v660_v54 = vsel %vm479_vm4, %v639_v43, 0.0 }
  0x3b   : > { %v519_v56 = vsel %vm479_vm4, %v514_v36, %v518_v45  ;;  %v590_v57 = vadd.f32 %v586_v15, %v583_v46  ;;  %v600_v58 = vsub.f32 %v589_v47, %v596_v39  ;;  %v642_v60 = vperm.slane %v996_v49, 0 }
  0x3c   : > { %v521_v61 = vsel %vm1248_vm9, %v519_v56, 0.0  ;;  %v643_v62 = vperm.slane %v996_v49, 1  ;;  %v654_v11 = vadd.f32 %v653_v52, %v652_v17  ;;  %v655_v1 = vsel %vm479_vm4, %v640_v50, 0.0 }
  0x3d   : > { %522 = vst.msk [vmem:[%s400_s17] sm:$0x3] %vm1092_vm0, %v521_v61  ;;  %v601_v3 = vsub.f32 %v590_v57, %v597_v41  ;;  %v657_v7 = vsel %vm479_vm4, %v642_v60, 0.0  ;;  %v661_v8 = vadd.f32 %v660_v54, %v659_v48  ;;  %v662_v5 = vsel %vm479_vm4, %v641_v51, 0.0 }
  0x3e   : > { %v656_v9 = vadd.f32 %v655_v1, %v654_v11  ;;  %v664_v10 = vsel %vm479_vm4, %v643_v62, 0.0  ;;  %v682_v24 = vperm.slane %v680_v14, 0  ;;  %v683_v20 = vperm.slane %v680_v14, 1 }
  0x3f   : > { %v604_v0 = vrot.slane %v601_v3, 7  ;;  %v663_v12 = vadd.f32 %v662_v5, %v661_v8 }
  0x40   : > { %v658_v53 = vadd.f32 %v657_v7, %v656_v9 }
  0x41   : > { %v605_v13 = vsel %vm479_vm4, %v600_v58, %v604_v0  ;;  %v665_v16 = vadd.f32 %v664_v10, %v663_v12 }
  0x42   : > { %v607_v19 = vsel %vm1248_vm9, %v605_v13, 0.0  ;;  %997 = vlog2.f32 %v658_v53 }
  0x43   : > { %608 = vst.msk [vmem:[%s408_s20] sm:$0x3] %vm1092_vm0, %v607_v19  ;;  %999 = vlog2.f32 %v665_v16 }
  0x48   : > { %v998_v29 = vpop.eup %997 }
  0x49   : > { %v1000_v21 = vpop.eup %999  ;;  %v667_v22 = vmul.f32 0.6931472, %v998_v29 }
  0x4a   : > { %v669_v23 = vmul.f32 0.6931472, %v1000_v21 }
  0x4b   : > { %v675_v25 = vadd.f32 %v671_v6, %v667_v22 }
  0x4c   : > { %v676_v26 = vadd.f32 %v672_v59, %v669_v23 }
  0x4d   : > { %v686_v27 = vsub.f32 %v675_v25, %v682_v24 }
  0x4e   : > { %v687_v15 = vsub.f32 %v676_v26, %v683_v20 }
  0x50   : > { %v690_v32 = vrot.slane %v687_v15, 7 }
  0x52   : > { %v691_v4 = vsel %vm479_vm4, %v686_v27, %v690_v32 }
  0x53   : > { %v693_v30 = vsel %vm1248_vm9, %v691_v4, 0.0 }
  0x54   : > { %694 = vst.msk [vmem:[%s416_s27] sm:$0x3] %vm1092_vm0, %v693_v30 }
  0x55 PF: > { %s17_s23 = sadd.s32 1, %s1023_s23   ;;  %s1322_s21 = smov %s1019_s22 }
  0x56   : > { %p14_p5 = scmp.ge.s32.totalorder %s17_s23, 4   ;;  %s1323_s22 = smov %s1325_s24 }
  0x58   :  { %16 = sbr.rel (!%p14_p5) target bundleno = 2 (0x2), region = 99 }

</bundles_post_ra>
